<compile_context>
chip_gen: v6e
topology: v6e:2x2x1
jax: 0.10.0
libtpu: 0.0.40
codegen_flags: <defaults>
</compile_context>

<pallas_src>
import jax
import jax.numpy as jnp
from jax.experimental import pallas as pl
from jax.experimental.pallas import tpu as pltpu


def _identity_dma_kernel(x_hbm, o_hbm, sem):
    # One direct HBM->HBM copy: exactly one read + one write of the tensor,
    # no VMEM staging, no per-tile overhead.
    cp = pltpu.make_async_copy(x_hbm, o_hbm, sem)
    cp.start()
    cp.wait()


def identity(x, *, use_kernel: bool = True):
    """nn.Identity forward.

    use_kernel=False: true zero-cost identity (returns x, zero HBM traffic).
    use_kernel=True : copies x through a single HBM->HBM DMA issued from a
                      Pallas kernel (HBM copy roofline, any shape/dtype).
    """
    if not use_kernel or x.size == 0 or x.ndim == 0:
        # Production path / degenerate shapes: identity is just the input.
        return x

    return pl.pallas_call(
        _identity_dma_kernel,
        out_shape=jax.ShapeDtypeStruct(x.shape, x.dtype),
        in_specs=[pl.BlockSpec(memory_space=pl.ANY)],
        out_specs=pl.BlockSpec(memory_space=pl.ANY),
        scratch_shapes=[pltpu.SemaphoreType.DMA(())],
    )(x)


if __name__ == "__main__":
    key = jax.random.PRNGKey(0)
    k1, k2, k3 = jax.random.split(key, 3)

    # Main test: the module's implied input shape, eager.
    x = jax.random.normal(k1, (2, 4, 16, 16), dtype=jnp.float32)
    y = identity(x)
    jax.block_until_ready(y)
    assert y.shape == x.shape
    assert y.dtype == x.dtype
    assert bool(jnp.all(y == x))

    # Same path under jit (wrapper compiles together with the custom call).
    y_jit = jax.jit(identity)(x)
    jax.block_until_ready(y_jit)
    assert bool(jnp.all(y_jit == x))

    # Ragged, non-(8,128)-divisible shape: no pad/slice needed with direct DMA.
    x2 = jax.random.normal(k2, (3, 5, 7), dtype=jnp.float32)
    y2 = identity(x2)
    jax.block_until_ready(y2)
    assert y2.shape == x2.shape
    assert bool(jnp.all(y2 == x2))

    # Packed dtype works identically (DMA is dtype-agnostic).
    x3 = jax.random.normal(k3, (2, 4, 16, 16), dtype=jnp.bfloat16)
    y3 = identity(x3)
    jax.block_until_ready(y3)
    assert y3.dtype == x3.dtype
    assert bool(jnp.all(y3 == x3))

    # Zero-cost production path: returns the input unchanged, no copy at all.
    assert identity(x, use_kernel=False) is x

    print("KERNEL_OK")
</pallas_src>

<mosaic_0001>
module attributes {stable_mosaic.version = 11 : i64} {
  func.func @_identity_dma_kernel(%arg0: memref<2x4x16x16xf32, #tpu.memory_space<any>>, %arg1: memref<2x4x16x16xf32, #tpu.memory_space<any>>, %arg2: memref<!tpu.dma_semaphore, #tpu.memory_space<semaphore_mem>>) attributes {dimension_semantics = [], scalar_prefetch = 0 : i64, scratch_operands = 1 : i64, tpu.core_type = #tpu.core_type<tc>} {
    tpu.enqueue_dma source(%arg0 : memref<2x4x16x16xf32, #tpu.memory_space<any>>) target(%arg1 : memref<2x4x16x16xf32, #tpu.memory_space<any>>) target_semaphore(%arg2 : memref<!tpu.dma_semaphore, #tpu.memory_space<semaphore_mem>>)
    tpu.wait_dma2 semaphore(%arg2 : memref<!tpu.dma_semaphore, #tpu.memory_space<semaphore_mem>>) src(%arg0 : memref<2x4x16x16xf32, #tpu.memory_space<any>>) dst(%arg1 : memref<2x4x16x16xf32, #tpu.memory_space<any>>)
    return
  }
}

</mosaic_0001>

<bundles_post_ra>
// kernel: tpu_custom_call.1
= control target key start
LH: loop header
LB: loop body
LE: loop exit
PB: predicated region body
PF: predicated region fallthrough
CT: control target
= control target key end

     0   :  { %s30_s6 = smov [#allocation2]   ;;  %s31_s7 = smov 131072   ;;  %s49_s0 = inlined_call_operand.hbm [shape: f32[2,4,16,16], index: 0, kind: input, shape index: {}]   ;;  %s50_s1 = inlined_call_operand.hbm [shape: f32[2,4,16,16], index: 1, kind: output, shape index: {}]  }
   0x1   :  { %s32_s8 = smov 0  }
   0x2   :  { %12 = dma.general %s49_s0, 2048, %s50_s1, %s30_s6, %s31_s7, [#allocation4], %s32_s8, 0  }
   0x3   :  { %28 = dma.done.wait [#allocation2], 2048 }
   0x4   :  { %29 = vsyncadd [#allocation2], 4294965248 }
   0x5   :  { %18 = vsyncmov [#allocation2] }
   0x8   :  { %s19_s13 = vpop.sfrf %18 }
   0x9   :  { %p24_p0 = scmp.ne.s32.totalorder %s19_s13, 0 }
   0xb   :  { %23 = shalt.err (%p24_p0)  }

</bundles_post_ra>
